<compile_context>
chip_gen: v5e
topology: v5e:2x2
jax: 0.10.0
libtpu: 0.0.40
codegen_flags: <defaults>
</compile_context>

<pallas_src>
import math

import jax
import jax.numpy as jnp
from jax import lax
from jax.experimental import pallas as pl
from jax.experimental.pallas import tpu as pltpu


# Above the 16/32 MiB default scoped limits on v5e/v6e, below v7x's 64 MiB.
_VMEM_LIMIT_BYTES = 48 * 1024 * 1024


def _fit_tile(dim, target):
    """Largest tile <= target that divides dim (halving search; fallback dim)."""
    if dim <= target:
        return dim
    t = target
    while t > 8 and dim % t != 0:
        t //= 2
    return t if dim % t == 0 else dim


# ----------------------------------------------------------------------------
# Tiled LoRA linear:  out = x @ Wt + mid @ Bt_scaled
#   x : [M, K]   Wt : [K, N]   mid = x @ At : [M, R]   Bt_scaled : [R, N]
# (weights pre-transposed; alpha/rank folded into Bt_scaled; mid precomputed
#  once outside the grid so the narrow-N LoRA-A matmul is not redone per N-tile)
# ----------------------------------------------------------------------------
def _lora_matmul_kernel(x_ref, wt_ref, mid_ref, bt_ref, o_ref, acc_ref):
    k = pl.program_id(2)

    @pl.when(k == 0)
    def _init():
        acc_ref[...] = jnp.zeros(acc_ref.shape, dtype=acc_ref.dtype)

    acc_ref[...] += jnp.dot(x_ref[...], wt_ref[...],
                            preferred_element_type=jnp.float32)

    @pl.when(k == pl.num_programs(2) - 1)
    def _finalize():
        lora = jnp.dot(mid_ref[...], bt_ref[...],
                       preferred_element_type=jnp.float32)
        o_ref[...] = (acc_ref[...] + lora).astype(o_ref.dtype)


def lora_linear(x, mid, wt, bt_scaled, *, tm=512, tn=512, tk=1024):
    M, K = x.shape
    _, N = wt.shape
    R = mid.shape[1]
    tm, tn, tk = _fit_tile(M, tm), _fit_tile(N, tn), _fit_tile(K, tk)
    grid = (M // tm, N // tn, K // tk)
    return pl.pallas_call(
        _lora_matmul_kernel,
        out_shape=jax.ShapeDtypeStruct((M, N), x.dtype),
        grid_spec=pltpu.PrefetchScalarGridSpec(
            num_scalar_prefetch=0,
            grid=grid,
            in_specs=[
                pl.BlockSpec((tm, tk), lambda i, j, k: (i, k)),
                pl.BlockSpec((tk, tn), lambda i, j, k: (k, j)),
                # mid/bt block indices are constant over k (and mid over j too),
                # so Pallas dedups their DMAs across the inner grid steps.
                pl.BlockSpec((tm, R), lambda i, j, k: (i, 0)),
                pl.BlockSpec((R, tn), lambda i, j, k: (0, j)),
            ],
            out_specs=pl.BlockSpec((tm, tn), lambda i, j, k: (i, j)),
            scratch_shapes=[pltpu.VMEM((tm, tn), jnp.float32)],
        ),
        compiler_params=pltpu.CompilerParams(
            dimension_semantics=("parallel", "parallel", "arbitrary"),
            vmem_limit_bytes=_VMEM_LIMIT_BYTES),
    )(x, wt, mid, bt_scaled)


# ----------------------------------------------------------------------------
# Flash-style causal attention (head-batched).
# Grid = (batch, head_group, q_tile, kv_tile); kv innermost ("arbitrary").
#   q/k/v refs : [th, T, Dh]   (q pre-rotated + pre-scaled, k pre-rotated)
#   output ref : [T, th*Dh]    (single lane-dense store)
# ----------------------------------------------------------------------------
def _flash_attn_kernel(q_ref, k_ref, v_ref, o_ref, m_ref, l_ref, acc_ref):
    q_tile = pl.program_id(2)
    kv_tile = pl.program_id(3)

    @pl.when(kv_tile == 0)
    def _init():
        m_ref[...] = jnp.full(m_ref.shape, -jnp.inf, dtype=m_ref.dtype)
        l_ref[...] = jnp.zeros(l_ref.shape, dtype=l_ref.dtype)
        acc_ref[...] = jnp.zeros(acc_ref.shape, dtype=acc_ref.dtype)

    # Skip KV tiles entirely above the causal diagonal.
    @pl.when(kv_tile <= q_tile)
    def _compute():
        # All heads of the group in one batched MXU op (no per-head unroll).
        s = jnp.einsum("hqd,hkd->hqk", q_ref[...], k_ref[...],
                       preferred_element_type=jnp.float32)

        def _apply_causal_mask(t):
            # Only valid because Tq == Tk: on the diagonal tile the mask is
            # purely local (col <= row).  Off-diagonal (kv < q) tiles need none.
            row = lax.broadcasted_iota(jnp.int32, t.shape, 1)
            col = lax.broadcasted_iota(jnp.int32, t.shape, 2)
            return jnp.where(col <= row, t, -1e30)

        s = lax.cond(kv_tile == q_tile, _apply_causal_mask, lambda t: t, s)

        m_prev = m_ref[...]
        m_new = jnp.maximum(m_prev, jnp.max(s, axis=-1, keepdims=True))
        alpha = jnp.exp(m_prev - m_new)
        p = jnp.exp(s - m_new)
        l_ref[...] = alpha * l_ref[...] + jnp.sum(p, axis=-1, keepdims=True)
        acc_ref[...] = alpha * acc_ref[...] + jnp.einsum(
            "hqk,hkd->hqd", p.astype(v_ref.dtype), v_ref[...],
            preferred_element_type=jnp.float32)
        m_ref[...] = m_new

    @pl.when(kv_tile == pl.num_programs(3) - 1)
    def _finalize():
        th = acc_ref.shape[0]
        out = acc_ref[...] * pl.reciprocal(l_ref[...], approx=True)  # [th,T,Dh]
        # Stack heads along the lane dim -> one lane-dense [T, th*Dh] store.
        slab = jnp.concatenate([out[h] for h in range(th)], axis=-1)
        o_ref[...] = slab.astype(o_ref.dtype)


def flash_causal_attention(q, k, v, *, block_size=256, block_h=None):
    """q, k, v: [B, H, S, Dh]; q already rotated and scaled by 1/sqrt(Dh),
    k already rotated.  Returns [B, S, H*Dh] (same layout as [B, S, D])."""
    B, H, S, Dh = q.shape
    T = _fit_tile(S, block_size)
    n_tiles = S // T

    if block_h is None:
        if Dh % 128 == 0:
            # Lane-aligned heads: group them to bound VMEM (v7x) while keeping
            # the output block a multiple of 128 lanes.
            block_h = max(d for d in range(1, min(H, 8) + 1) if H % d == 0)
        else:
            # Small head_dim (demo config): take all heads so the output block
            # spans the full D columns (lane-dense, satisfies layout rules).
            block_h = H
    assert H % block_h == 0
    n_hg = H // block_h

    # NOTE: the jnp.minimum clamp relies on the kv axis being the innermost
    # grid axis, so skipped (fully masked) tiles repeat the previous block
    # index and Pallas dedups their DMAs.
    q_spec = pl.BlockSpec((pl.Squeezed(), block_h, T, Dh),
                          lambda b, hg, qi, ki: (b, hg, qi, 0))
    kv_spec = pl.BlockSpec((pl.Squeezed(), block_h, T, Dh),
                           lambda b, hg, qi, ki: (b, hg, jnp.minimum(ki, qi), 0))
    out_spec = pl.BlockSpec((pl.Squeezed(), T, block_h * Dh),
                            lambda b, hg, qi, ki: (b, qi, hg))

    return pl.pallas_call(
        _flash_attn_kernel,
        out_shape=jax.ShapeDtypeStruct((B, S, H * Dh), q.dtype),
        grid_spec=pltpu.PrefetchScalarGridSpec(
            num_scalar_prefetch=0,
            grid=(B, n_hg, n_tiles, n_tiles),
            in_specs=[q_spec, kv_spec, kv_spec],
            out_specs=out_spec,
            scratch_shapes=[
                pltpu.VMEM((block_h, T, 1), jnp.float32),   # running max
                pltpu.VMEM((block_h, T, 1), jnp.float32),   # running denom
                pltpu.VMEM((block_h, T, Dh), jnp.float32),  # output accumulator
            ],
        ),
        compiler_params=pltpu.CompilerParams(
            dimension_semantics=("parallel", "parallel", "parallel", "arbitrary"),
            vmem_limit_bytes=_VMEM_LIMIT_BYTES),
    )(q, k, v)


# ----------------------------------------------------------------------------
# Parameter packing (done once, outside any kernel).
# NoInitLoraLinear:  y = x @ W.T + scaling * ((x @ A.T) @ B.T)
#   W:[Dout,Din]  A:[r,Din]  B:[Dout,r]
# ----------------------------------------------------------------------------
def pack_attention_params(params, dtype=jnp.bfloat16):
    scaling = params["scaling"]
    wq, aq, bq = params["q"]
    wk, ak, bk = params["k"]
    wv, av, bv = params["v"]
    wo, ao, bo = params["o"]
    dout = wq.shape[0]
    r = aq.shape[0]

    # Fused q/k/v: base weight [Din, 3D], LoRA-A [Din, 3r],
    # LoRA-B block-diagonal [3r, 3D] with alpha/rank folded in.
    qkv_wt = jnp.concatenate([wq.T, wk.T, wv.T], axis=1).astype(dtype)
    qkv_at = jnp.concatenate([aq.T, ak.T, av.T], axis=1).astype(dtype)
    bt = jnp.zeros((3 * r, 3 * dout), jnp.float32)
    bt = bt.at[0 * r:1 * r, 0 * dout:1 * dout].set(scaling * bq.T.astype(jnp.float32))
    bt = bt.at[1 * r:2 * r, 1 * dout:2 * dout].set(scaling * bk.T.astype(jnp.float32))
    bt = bt.at[2 * r:3 * r, 2 * dout:3 * dout].set(scaling * bv.T.astype(jnp.float32))
    return {
        "qkv_wt": qkv_wt,
        "qkv_at": qkv_at,
        "qkv_bt": bt.astype(dtype),
        "o_wt": wo.T.astype(dtype),
        "o_at": ao.T.astype(dtype),
        "o_bt": (scaling * bo.T.astype(jnp.float32)).astype(dtype),
    }


# ----------------------------------------------------------------------------
# Rotary cos/sin cache — mirrors RotaryEmbedding.
# ----------------------------------------------------------------------------
def rotary_cos_sin(seq_len, head_dim, base=10000.0, dtype=jnp.float32):
    inv_freq = 1.0 / (base ** (jnp.arange(0, head_dim, 2, dtype=jnp.float32)
                               / head_dim))
    t = jnp.arange(seq_len, dtype=jnp.float32)
    freqs = jnp.einsum("i,j->ij", t, inv_freq)          # [S, Dh/2]
    emb = jnp.concatenate([freqs, freqs], axis=-1)      # [S, Dh]
    return jnp.cos(emb).astype(dtype), jnp.sin(emb).astype(dtype)


def _rotate_half(t):
    h = t.shape[-1] // 2
    return jnp.concatenate([-t[..., h:], t[..., :h]], axis=-1)


# ----------------------------------------------------------------------------
# Full Attention.forward (use_kv_cache=False, attention_mask=None path)
# ----------------------------------------------------------------------------
def attention_forward(hidden_states, packed, cos, sin, n_heads):
    B, S, D = hidden_states.shape
    Dh = D // n_heads
    x2d = hidden_states.reshape(B * S, D)

    # Hoisted LoRA-A projection (tiny [M, 3r] matmul; done once, not per N-tile).
    qkv_mid = jnp.dot(x2d, packed["qkv_at"],
                      preferred_element_type=jnp.float32).astype(x2d.dtype)
    qkv = lora_linear(x2d, qkv_mid, packed["qkv_wt"], packed["qkv_bt"])
    qkv = qkv.reshape(B, S, 3, n_heads, Dh)

    # One-time head-major relayout + RoPE (+ 1/sqrt(Dh) folded into q).
    # Cheap XLA elementwise/transpose prep pass so K is rotated exactly once
    # (not per q_tile) and the attention kernel sees [B, H, S, Dh].
    # TODO(synk): move into a Pallas prep kernel once per-head slicing of the
    #             [B,S,3,H,Dh] layout (second-minor block of 1) is layout-legal.
    q = jnp.transpose(qkv[:, :, 0], (0, 2, 1, 3)).astype(jnp.float32)
    k = jnp.transpose(qkv[:, :, 1], (0, 2, 1, 3)).astype(jnp.float32)
    v = jnp.transpose(qkv[:, :, 2], (0, 2, 1, 3))
    c = cos.astype(jnp.float32)[None, None]
    s = sin.astype(jnp.float32)[None, None]
    scale = 1.0 / math.sqrt(Dh)
    q = ((q * c + _rotate_half(q) * s) * scale).astype(v.dtype)
    k = (k * c + _rotate_half(k) * s).astype(v.dtype)

    attn = flash_causal_attention(q, k, v)              # [B, S, D] lane-dense

    attn2d = attn.reshape(B * S, D)
    o_mid = jnp.dot(attn2d, packed["o_at"],
                    preferred_element_type=jnp.float32).astype(attn2d.dtype)
    out = lora_linear(attn2d, o_mid, packed["o_wt"], packed["o_bt"])
    return out.reshape(B, S, D)


# ----------------------------------------------------------------------------
# Synthetic params + pure-JAX reference for a sanity check
# ----------------------------------------------------------------------------
def init_params(key, dim, rank, dtype=jnp.bfloat16):
    params = {"scaling": 16.0 / rank}                   # alpha = 16
    std = math.sqrt(2.0 / (5.0 * dim))
    keys = jax.random.split(key, 12)
    for i, name in enumerate(["q", "k", "v", "o"]):
        kw, ka, kb = keys[3 * i], keys[3 * i + 1], keys[3 * i + 2]
        w = (std * jax.random.normal(kw, (dim, dim))).astype(dtype)
        a = (std * jax.random.normal(ka, (rank, dim))).astype(dtype)
        b = (0.02 * jax.random.normal(kb, (dim, rank))).astype(dtype)
        params[name] = (w, a, b)
    return params


def reference_forward(hidden_states, params, cos, sin, n_heads):
    """Pure-JAX (f32) mirror of the PyTorch module."""
    B, S, D = hidden_states.shape
    Dh = D // n_heads
    scaling = params["scaling"]
    x = hidden_states.astype(jnp.float32).reshape(B * S, D)

    def lora(x2d, w, a, b):
        w, a, b = (t.astype(jnp.float32) for t in (w, a, b))
        return x2d @ w.T + scaling * ((x2d @ a.T) @ b.T)

    def heads(t):
        return t.reshape(B, S, n_heads, Dh).transpose(0, 2, 1, 3)

    q = heads(lora(x, *params["q"]))
    k = heads(lora(x, *params["k"]))
    v = heads(lora(x, *params["v"]))

    c = cos.astype(jnp.float32)[None, None]
    s = sin.astype(jnp.float32)[None, None]
    q = q * c + _rotate_half(q) * s
    k = k * c + _rotate_half(k) * s

    logits = jnp.einsum("bhqd,bhkd->bhqk", q, k) / math.sqrt(Dh)
    mask = jnp.tril(jnp.ones((S, S), dtype=bool))
    logits = jnp.where(mask[None, None], logits, -jnp.inf)
    p = jax.nn.softmax(logits, axis=-1)
    o = jnp.einsum("bhqk,bhkd->bhqd", p, v)
    o = o.transpose(0, 2, 1, 3).reshape(B * S, D)
    return lora(o, *params["o"]).reshape(B, S, D)


if __name__ == "__main__":
    # Small config consistent with LLaMAConfig: dim=64, n_heads=4 -> head_dim=16
    B, S, D, H, RANK = 2, 8, 64, 4, 16
    DTYPE = jnp.bfloat16                                # module default dtype

    key = jax.random.PRNGKey(0)
    k_x, k_p = jax.random.split(key)

    hidden_states = jax.random.normal(k_x, (B, S, D), dtype=jnp.float32).astype(DTYPE)
    params = init_params(k_p, D, RANK, dtype=DTYPE)
    packed = pack_attention_params(params, dtype=DTYPE)
    cos, sin = rotary_cos_sin(S, D // H)

    fwd = jax.jit(attention_forward, static_argnames=("n_heads",))
    out = fwd(hidden_states, packed, cos, sin, n_heads=H)
    jax.block_until_ready(out)
    assert out.shape == (B, S, D)

    ref = reference_forward(hidden_states, params, cos, sin, n_heads=H)
    err = float(jnp.max(jnp.abs(out.astype(jnp.float32) - ref)))
    assert err < 5e-2, f"max abs error vs reference too large: {err}"

    print("KERNEL_OK")
</pallas_src>

<mosaic_0001>
module attributes {stable_mosaic.version = 11 : i64} {
  func.func @_lora_matmul_kernel(%arg0: i32, %arg1: i32, %arg2: i32, %arg3: memref<16x64xbf16, #tpu.memory_space<vmem>>, %arg4: memref<64x192xbf16, #tpu.memory_space<vmem>>, %arg5: memref<16x48xbf16, #tpu.memory_space<vmem>>, %arg6: memref<48x192xbf16, #tpu.memory_space<vmem>>, %arg7: memref<16x192xbf16, #tpu.memory_space<vmem>>, %arg8: memref<16x192xf32, #tpu.memory_space<vmem>>) attributes {dimension_semantics = [#tpu.dimension_semantics<parallel>, #tpu.dimension_semantics<parallel>, #tpu.dimension_semantics<arbitrary>], iteration_bounds = array<i64: 1, 1, 1>, scalar_prefetch = 0 : i64, scratch_operands = 1 : i64, tpu.core_type = #tpu.core_type<tc>, window_params = [{transform_indices = @transform_0, window_bounds = array<i64: 16, 64>}, {transform_indices = @transform_1, window_bounds = array<i64: 64, 192>}, {transform_indices = @transform_2, window_bounds = array<i64: 16, 48>}, {transform_indices = @transform_3, window_bounds = array<i64: 48, 192>}, {transform_indices = @transform_4, window_bounds = array<i64: 16, 192>}]} {
    %c0_i32 = arith.constant 0 : i32
    %0 = arith.cmpi eq, %arg2, %c0_i32 : i32
    %1 = arith.extui %0 : i1 to i32
    %c0_i32_0 = arith.constant 0 : i32
    %2 = arith.cmpi ne, %1, %c0_i32_0 : i32
    scf.if %2 {
      %cst_10 = arith.constant 0.000000e+00 : f32
      %12 = vector.broadcast %cst_10 : f32 to vector<16x192xf32>
      %c0_11 = arith.constant 0 : index
      %c0_12 = arith.constant 0 : index
      %13 = vector.load %arg8[%c0_11, %c0_12] : memref<16x192xf32, #tpu.memory_space<vmem>>, vector<16x192xf32>
      tpu.vector_store %arg8[%c0_11, %c0_12], %12 {strides = array<i32>} : memref<16x192xf32, #tpu.memory_space<vmem>>, vector<16x192xf32>,
    } else {
    }
    %c0 = arith.constant 0 : index
    %c0_1 = arith.constant 0 : index
    %3 = vector.load %arg8[%c0, %c0_1] : memref<16x192xf32, #tpu.memory_space<vmem>>, vector<16x192xf32>
    %c0_2 = arith.constant 0 : index
    %c0_3 = arith.constant 0 : index
    %4 = vector.load %arg3[%c0_2, %c0_3] : memref<16x64xbf16, #tpu.memory_space<vmem>>, vector<16x64xbf16>
    %c0_4 = arith.constant 0 : index
    %c0_5 = arith.constant 0 : index
    %5 = vector.load %arg4[%c0_4, %c0_5] : memref<64x192xbf16, #tpu.memory_space<vmem>>, vector<64x192xbf16>
    %cst = arith.constant dense<0.000000e+00> : vector<16x192xf32>
    %6 = tpu.matmul %4, %5, %cst {dimension_numbers = #tpu.dot_dimension_numbers<[1], [0], [0], [1], [0, 0, 1, 1], [], []>} : vector<16x64xbf16>, vector<64x192xbf16>, vector<16x192xf32> -> vector<16x192xf32>
    %7 = arith.addf %3, %6 : vector<16x192xf32>
    %c0_6 = arith.constant 0 : index
    %c0_7 = arith.constant 0 : index
    %8 = vector.load %arg8[%c0_6, %c0_7] : memref<16x192xf32, #tpu.memory_space<vmem>>, vector<16x192xf32>
    tpu.vector_store %arg8[%c0_6, %c0_7], %7 {strides = array<i32>} : memref<16x192xf32, #tpu.memory_space<vmem>>, vector<16x192xf32>,
    %c0_i32_8 = arith.constant 0 : i32
    %9 = arith.cmpi eq, %arg2, %c0_i32_8 : i32
    %10 = arith.extui %9 : i1 to i32
    %c0_i32_9 = arith.constant 0 : i32
    %11 = arith.cmpi ne, %10, %c0_i32_9 : i32
    scf.if %11 {
      %c0_10 = arith.constant 0 : index
      %c0_11 = arith.constant 0 : index
      %12 = vector.load %arg5[%c0_10, %c0_11] : memref<16x48xbf16, #tpu.memory_space<vmem>>, vector<16x48xbf16>
      %c0_12 = arith.constant 0 : index
      %c0_13 = arith.constant 0 : index
      %13 = vector.load %arg6[%c0_12, %c0_13] : memref<48x192xbf16, #tpu.memory_space<vmem>>, vector<48x192xbf16>
      %cst_14 = arith.constant dense<0.000000e+00> : vector<16x192xf32>
      %14 = tpu.matmul %12, %13, %cst_14 {dimension_numbers = #tpu.dot_dimension_numbers<[1], [0], [0], [1], [0, 0, 1, 1], [], []>} : vector<16x48xbf16>, vector<48x192xbf16>, vector<16x192xf32> -> vector<16x192xf32>
      %c0_15 = arith.constant 0 : index
      %c0_16 = arith.constant 0 : index
      %15 = vector.load %arg8[%c0_15, %c0_16] : memref<16x192xf32, #tpu.memory_space<vmem>>, vector<16x192xf32>
      %16 = arith.addf %15, %14 : vector<16x192xf32>
      %17 = arith.truncf %16 : vector<16x192xf32> to vector<16x192xbf16>
      %c0_17 = arith.constant 0 : index
      %c0_18 = arith.constant 0 : index
      %18 = vector.load %arg7[%c0_17, %c0_18] : memref<16x192xbf16, #tpu.memory_space<vmem>>, vector<16x192xbf16>
      tpu.vector_store %arg7[%c0_17, %c0_18], %17 {strides = array<i32>} : memref<16x192xbf16, #tpu.memory_space<vmem>>, vector<16x192xbf16>,
    } else {
    }
    return
  }
  func.func @transform_0(%arg0: i32, %arg1: i32, %arg2: i32) -> (i32, i32) {
    %c0_i32 = arith.constant 0 : i32
    return %arg0, %arg2 : i32, i32
  }
  func.func @transform_1(%arg0: i32, %arg1: i32, %arg2: i32) -> (i32, i32) {
    %c0_i32 = arith.constant 0 : i32
    return %arg2, %arg1 : i32, i32
  }
  func.func @transform_2(%arg0: i32, %arg1: i32, %arg2: i32) -> (i32, i32) {
    %c0_i32 = arith.constant 0 : i32
    %c0_i32_0 = arith.constant 0 : i32
    return %arg0, %c0_i32 : i32, i32
  }
  func.func @transform_3(%arg0: i32, %arg1: i32, %arg2: i32) -> (i32, i32) {
    %c0_i32 = arith.constant 0 : i32
    %c0_i32_0 = arith.constant 0 : i32
    return %c0_i32, %arg1 : i32, i32
  }
  func.func @transform_4(%arg0: i32, %arg1: i32, %arg2: i32) -> (i32, i32) {
    %c0_i32 = arith.constant 0 : i32
    return %arg0, %arg1 : i32, i32
  }
}

module attributes {stable_mosaic.version = 11 : i64} {
  func.func @_flash_attn_kernel(%arg0: i32, %arg1: i32, %arg2: i32, %arg3: i32, %arg4: memref<1x4x8x16xbf16, #tpu.memory_space<vmem>>, %arg5: memref<1x4x8x16xbf16, #tpu.memory_space<vmem>>, %arg6: memref<1x4x8x16xbf16, #tpu.memory_space<vmem>>, %arg7: memref<1x8x64xbf16, #tpu.memory_space<vmem>>, %arg8: memref<4x8x1xf32, #tpu.memory_space<vmem>>, %arg9: memref<4x8x1xf32, #tpu.memory_space<vmem>>, %arg10: memref<4x8x16xf32, #tpu.memory_space<vmem>>) attributes {dimension_semantics = [#tpu.dimension_semantics<parallel>, #tpu.dimension_semantics<parallel>, #tpu.dimension_semantics<parallel>, #tpu.dimension_semantics<arbitrary>], iteration_bounds = array<i64: 2, 1, 1, 1>, scalar_prefetch = 0 : i64, scratch_operands = 3 : i64, tpu.core_type = #tpu.core_type<tc>, window_params = [{transform_indices = @transform_0, window_bounds = array<i64: 1, 4, 8, 16>}, {transform_indices = @transform_1, window_bounds = array<i64: 1, 4, 8, 16>}, {transform_indices = @transform_2, window_bounds = array<i64: 1, 4, 8, 16>}, {transform_indices = @transform_3, window_bounds = array<i64: 1, 8, 64>}]} {
    %c0_i32 = arith.constant 0 : i32
    %0 = arith.cmpi eq, %arg3, %c0_i32 : i32
    %1 = arith.extui %0 : i1 to i32
    %c0_i32_0 = arith.constant 0 : i32
    %2 = arith.cmpi ne, %1, %c0_i32_0 : i32
    scf.if %2 {
      %cst = arith.constant 0xFF800000 : f32
      %9 = vector.broadcast %cst : f32 to vector<4x8x1xf32>
      %c0 = arith.constant 0 : index
      %c0_4 = arith.constant 0 : index
      %c0_5 = arith.constant 0 : index
      %10 = vector.load %arg8[%c0, %c0_4, %c0_5] : memref<4x8x1xf32, #tpu.memory_space<vmem>>, vector<4x8x1xf32>
      tpu.vector_store %arg8[%c0, %c0_4, %c0_5], %9 {strides = array<i32>} : memref<4x8x1xf32, #tpu.memory_space<vmem>>, vector<4x8x1xf32>,
      %cst_6 = arith.constant 0.000000e+00 : f32
      %11 = vector.broadcast %cst_6 : f32 to vector<4x8x1xf32>
      %c0_7 = arith.constant 0 : index
      %c0_8 = arith.constant 0 : index
      %c0_9 = arith.constant 0 : index
      %12 = vector.load %arg9[%c0_7, %c0_8, %c0_9] : memref<4x8x1xf32, #tpu.memory_space<vmem>>, vector<4x8x1xf32>
      tpu.vector_store %arg9[%c0_7, %c0_8, %c0_9], %11 {strides = array<i32>} : memref<4x8x1xf32, #tpu.memory_space<vmem>>, vector<4x8x1xf32>,
      %cst_10 = arith.constant 0.000000e+00 : f32
      %13 = vector.broadcast %cst_10 : f32 to vector<4x8x16xf32>
      %c0_11 = arith.constant 0 : index
      %c0_12 = arith.constant 0 : index
      %c0_13 = arith.constant 0 : index
      %14 = vector.load %arg10[%c0_11, %c0_12, %c0_13] : memref<4x8x16xf32, #tpu.memory_space<vmem>>, vector<4x8x16xf32>
      tpu.vector_store %arg10[%c0_11, %c0_12, %c0_13], %13 {strides = array<i32>} : memref<4x8x16xf32, #tpu.memory_space<vmem>>, vector<4x8x16xf32>,
    } else {
    }
    %3 = arith.cmpi sle, %arg3, %arg2 : i32
    %4 = arith.extui %3 : i1 to i32
    %c0_i32_1 = arith.constant 0 : i32
    %5 = arith.cmpi ne, %4, %c0_i32_1 : i32
    scf.if %5 {
      %c0 = arith.constant 0 : index
      %c0_4 = arith.constant 0 : index
      %c0_5 = arith.constant 0 : index
      %c0_6 = arith.constant 0 : index
      %9 = vector.load %arg4[%c0, %c0_4, %c0_5, %c0_6] : memref<1x4x8x16xbf16, #tpu.memory_space<vmem>>, vector<1x4x8x16xbf16>
      %10 = vector.shape_cast %9 : vector<1x4x8x16xbf16> to vector<4x8x16xbf16>
      %c0_7 = arith.constant 0 : index
      %c0_8 = arith.constant 0 : index
      %c0_9 = arith.constant 0 : index
      %c0_10 = arith.constant 0 : index
      %11 = vector.load %arg5[%c0_7, %c0_8, %c0_9, %c0_10] : memref<1x4x8x16xbf16, #tpu.memory_space<vmem>>, vector<1x4x8x16xbf16>
      %12 = vector.shape_cast %11 : vector<1x4x8x16xbf16> to vector<4x8x16xbf16>
      "tpu.trace_start"() <{level = 10 : i32, message = "hqd,hkd->hqk"}> : () -> ()
      %cst = arith.constant dense<0.000000e+00> : vector<4x8x8xf32>
      %13 = tpu.matmul %10, %12, %cst {dimension_numbers = #tpu.dot_dimension_numbers<[2], [2], [1], [1], [0, 0, 0, 1, 1, 1], [0], [0]>} : vector<4x8x16xbf16>, vector<4x8x16xbf16>, vector<4x8x8xf32> -> vector<4x8x8xf32>
      "tpu.trace_stop"() : () -> ()
      %14 = arith.cmpi eq, %arg3, %arg2 : i32
      %15 = arith.extui %14 : i1 to i32
      %c0_i32_11 = arith.constant 0 : i32
      %16 = arith.cmpi ne, %15, %c0_i32_11 : i32
      %17 = scf.if %16 -> (vector<4x8x8xf32>) {
        %43 = tpu.iota {dimensions = array<i32: 1>} : vector<4x8x8xi32>
        %44 = tpu.iota {dimensions = array<i32: 2>} : vector<4x8x8xi32>
        %45 = arith.cmpi sle, %44, %43 : vector<4x8x8xi32>
        %cst_37 = arith.constant -1.000000e+30 : f32
        %46 = vector.broadcast %cst_37 : f32 to vector<4x8x8xf32>
        %47 = arith.select %45, %13, %46 : vector<4x8x8xi1>, vector<4x8x8xf32>
        scf.yield %47 : vector<4x8x8xf32>
      } else {
        scf.yield %13 : vector<4x8x8xf32>
      }
      %c0_12 = arith.constant 0 : index
      %c0_13 = arith.constant 0 : index
      %c0_14 = arith.constant 0 : index
      %18 = vector.load %arg8[%c0_12, %c0_13, %c0_14] : memref<4x8x1xf32, #tpu.memory_space<vmem>>, vector<4x8x1xf32>
      %cst_15 = arith.constant dense<0xFF800000> : vector<4x8xf32>
      %19 = vector.multi_reduction <maximumf>, %17, %cst_15 [2] : vector<4x8x8xf32> to vector<4x8xf32>
      %20 = vector.shape_cast %19 : vector<4x8xf32> to vector<4x8x1xf32>
      %21 = arith.maximumf %18, %20 : vector<4x8x1xf32>
      %22 = arith.subf %18, %21 : vector<4x8x1xf32>
      %23 = math.exp %22 : vector<4x8x1xf32>
      %24 = vector.broadcast %21 : vector<4x8x1xf32> to vector<4x8x8xf32>
      %25 = arith.subf %17, %24 : vector<4x8x8xf32>
      %26 = math.exp %25 : vector<4x8x8xf32>
      %c0_16 = arith.constant 0 : index
      %c0_17 = arith.constant 0 : index
      %c0_18 = arith.constant 0 : index
      %27 = vector.load %arg9[%c0_16, %c0_17, %c0_18] : memref<4x8x1xf32, #tpu.memory_space<vmem>>, vector<4x8x1xf32>
      %28 = arith.mulf %23, %27 : vector<4x8x1xf32>
      %cst_19 = arith.constant dense<0.000000e+00> : vector<4x8xf32>
      %29 = vector.multi_reduction <add>, %26, %cst_19 [2] : vector<4x8x8xf32> to vector<4x8xf32>
      %30 = vector.shape_cast %29 : vector<4x8xf32> to vector<4x8x1xf32>
      %31 = arith.addf %28, %30 : vector<4x8x1xf32>
      %c0_20 = arith.constant 0 : index
      %c0_21 = arith.constant 0 : index
      %c0_22 = arith.constant 0 : index
      %32 = vector.load %arg9[%c0_20, %c0_21, %c0_22] : memref<4x8x1xf32, #tpu.memory_space<vmem>>, vector<4x8x1xf32>
      tpu.vector_store %arg9[%c0_20, %c0_21, %c0_22], %31 {strides = array<i32>} : memref<4x8x1xf32, #tpu.memory_space<vmem>>, vector<4x8x1xf32>,
      %c0_23 = arith.constant 0 : index
      %c0_24 = arith.constant 0 : index
      %c0_25 = arith.constant 0 : index
      %33 = vector.load %arg10[%c0_23, %c0_24, %c0_25] : memref<4x8x16xf32, #tpu.memory_space<vmem>>, vector<4x8x16xf32>
      %34 = vector.broadcast %23 : vector<4x8x1xf32> to vector<4x8x16xf32>
      %35 = arith.mulf %34, %33 : vector<4x8x16xf32>
      %36 = arith.truncf %26 : vector<4x8x8xf32> to vector<4x8x8xbf16>
      %c0_26 = arith.constant 0 : index
      %c0_27 = arith.constant 0 : index
      %c0_28 = arith.constant 0 : index
      %c0_29 = arith.constant 0 : index
      %37 = vector.load %arg6[%c0_26, %c0_27, %c0_28, %c0_29] : memref<1x4x8x16xbf16, #tpu.memory_space<vmem>>, vector<1x4x8x16xbf16>
      %38 = vector.shape_cast %37 : vector<1x4x8x16xbf16> to vector<4x8x16xbf16>
      "tpu.trace_start"() <{level = 10 : i32, message = "hqk,hkd->hqd"}> : () -> ()
      %cst_30 = arith.constant dense<0.000000e+00> : vector<4x8x16xf32>
      %39 = tpu.matmul %36, %38, %cst_30 {dimension_numbers = #tpu.dot_dimension_numbers<[2], [1], [1], [2], [0, 0, 0, 1, 1, 2], [0], [0]>} : vector<4x8x8xbf16>, vector<4x8x16xbf16>, vector<4x8x16xf32> -> vector<4x8x16xf32>
      "tpu.trace_stop"() : () -> ()
      %40 = arith.addf %35, %39 : vector<4x8x16xf32>
      %c0_31 = arith.constant 0 : index
      %c0_32 = arith.constant 0 : index
      %c0_33 = arith.constant 0 : index
      %41 = vector.load %arg10[%c0_31, %c0_32, %c0_33] : memref<4x8x16xf32, #tpu.memory_space<vmem>>, vector<4x8x16xf32>
      tpu.vector_store %arg10[%c0_31, %c0_32, %c0_33], %40 {strides = array<i32>} : memref<4x8x16xf32, #tpu.memory_space<vmem>>, vector<4x8x16xf32>,
      %c0_34 = arith.constant 0 : index
      %c0_35 = arith.constant 0 : index
      %c0_36 = arith.constant 0 : index
      %42 = vector.load %arg8[%c0_34, %c0_35, %c0_36] : memref<4x8x1xf32, #tpu.memory_space<vmem>>, vector<4x8x1xf32>
      tpu.vector_store %arg8[%c0_34, %c0_35, %c0_36], %21 {strides = array<i32>} : memref<4x8x1xf32, #tpu.memory_space<vmem>>, vector<4x8x1xf32>,
    } else {
    }
    %c0_i32_2 = arith.constant 0 : i32
    %6 = arith.cmpi eq, %arg3, %c0_i32_2 : i32
    %7 = arith.extui %6 : i1 to i32
    %c0_i32_3 = arith.constant 0 : i32
    %8 = arith.cmpi ne, %7, %c0_i32_3 : i32
    scf.if %8 {
      %c0 = arith.constant 0 : index
      %c0_4 = arith.constant 0 : index
      %c0_5 = arith.constant 0 : index
      %9 = vector.load %arg10[%c0, %c0_4, %c0_5] : memref<4x8x16xf32, #tpu.memory_space<vmem>>, vector<4x8x16xf32>
      %c0_6 = arith.constant 0 : index
      %c0_7 = arith.constant 0 : index
      %c0_8 = arith.constant 0 : index
      %10 = vector.load %arg9[%c0_6, %c0_7, %c0_8] : memref<4x8x1xf32, #tpu.memory_space<vmem>>, vector<4x8x1xf32>
      %11 = tpu.reciprocal %10 {approx = true} : vector<4x8x1xf32> -> vector<4x8x1xf32>
      %12 = vector.broadcast %11 : vector<4x8x1xf32> to vector<4x8x16xf32>
      %13 = arith.mulf %9, %12 : vector<4x8x16xf32>
      %14 = vector.extract_strided_slice %13 {offsets = [0, 0, 0], sizes = [1, 8, 16], strides = [1, 1, 1]} : vector<4x8x16xf32> to vector<1x8x16xf32>
      %15 = vector.shape_cast %14 : vector<1x8x16xf32> to vector<8x16xf32>
      %16 = vector.extract_strided_slice %13 {offsets = [1, 0, 0], sizes = [1, 8, 16], strides = [1, 1, 1]} : vector<4x8x16xf32> to vector<1x8x16xf32>
      %17 = vector.shape_cast %16 : vector<1x8x16xf32> to vector<8x16xf32>
      %18 = vector.extract_strided_slice %13 {offsets = [2, 0, 0], sizes = [1, 8, 16], strides = [1, 1, 1]} : vector<4x8x16xf32> to vector<1x8x16xf32>
      %19 = vector.shape_cast %18 : vector<1x8x16xf32> to vector<8x16xf32>
      %20 = vector.extract_strided_slice %13 {offsets = [3, 0, 0], sizes = [1, 8, 16], strides = [1, 1, 1]} : vector<4x8x16xf32> to vector<1x8x16xf32>
      %21 = vector.shape_cast %20 : vector<1x8x16xf32> to vector<8x16xf32>
      %22 = tpu.concatenate %15, %17, %19, %21 in 1 : vector<8x16xf32>, vector<8x16xf32>, vector<8x16xf32>, vector<8x16xf32> -> vector<8x64xf32>
      %23 = arith.truncf %22 : vector<8x64xf32> to vector<8x64xbf16>
      %c0_9 = arith.constant 0 : index
      %c0_10 = arith.constant 0 : index
      %c0_11 = arith.constant 0 : index
      %24 = vector.load %arg7[%c0_9, %c0_10, %c0_11] : memref<1x8x64xbf16, #tpu.memory_space<vmem>>, vector<1x8x64xbf16>
      %25 = vector.shape_cast %24 : vector<1x8x64xbf16> to vector<8x64xbf16>
      %26 = vector.shape_cast %23 : vector<8x64xbf16> to vector<1x8x64xbf16>
      tpu.vector_store %arg7[%c0_9, %c0_10, %c0_11], %26 {strides = array<i32>} : memref<1x8x64xbf16, #tpu.memory_space<vmem>>, vector<1x8x64xbf16>,
    } else {
    }
    return
  }
  func.func @transform_0(%arg0: i32, %arg1: i32, %arg2: i32, %arg3: i32) -> (i32, i32, i32, i32) {
    %c0_i32 = arith.constant 0 : i32
    %c0_i32_0 = arith.constant 0 : i32
    return %arg0, %arg1, %arg2, %c0_i32 : i32, i32, i32, i32
  }
  func.func @transform_1(%arg0: i32, %arg1: i32, %arg2: i32, %arg3: i32) -> (i32, i32, i32, i32) {
    %0 = arith.minsi %arg3, %arg2 : i32
    %c0_i32 = arith.constant 0 : i32
    %c0_i32_0 = arith.constant 0 : i32
    return %arg0, %arg1, %0, %c0_i32 : i32, i32, i32, i32
  }
  func.func @transform_2(%arg0: i32, %arg1: i32, %arg2: i32, %arg3: i32) -> (i32, i32, i32, i32) {
    %0 = arith.minsi %arg3, %arg2 : i32
    %c0_i32 = arith.constant 0 : i32
    %c0_i32_0 = arith.constant 0 : i32
    return %arg0, %arg1, %0, %c0_i32 : i32, i32, i32, i32
  }
  func.func @transform_3(%arg0: i32, %arg1: i32, %arg2: i32, %arg3: i32) -> (i32, i32, i32) {
    %c0_i32 = arith.constant 0 : i32
    return %arg0, %arg2, %arg1 : i32, i32, i32
  }
}

module attributes {stable_mosaic.version = 11 : i64} {
  func.func @_lora_matmul_kernel(%arg0: i32, %arg1: i32, %arg2: i32, %arg3: memref<16x64xbf16, #tpu.memory_space<vmem>>, %arg4: memref<64x64xbf16, #tpu.memory_space<vmem>>, %arg5: memref<16x16xbf16, #tpu.memory_space<vmem>>, %arg6: memref<16x64xbf16, #tpu.memory_space<vmem>>, %arg7: memref<16x64xbf16, #tpu.memory_space<vmem>>, %arg8: memref<16x64xf32, #tpu.memory_space<vmem>>) attributes {dimension_semantics = [#tpu.dimension_semantics<parallel>, #tpu.dimension_semantics<parallel>, #tpu.dimension_semantics<arbitrary>], iteration_bounds = array<i64: 1, 1, 1>, scalar_prefetch = 0 : i64, scratch_operands = 1 : i64, tpu.core_type = #tpu.core_type<tc>, window_params = [{transform_indices = @transform_0, window_bounds = array<i64: 16, 64>}, {transform_indices = @transform_1, window_bounds = array<i64: 64, 64>}, {transform_indices = @transform_2, window_bounds = array<i64: 16, 16>}, {transform_indices = @transform_3, window_bounds = array<i64: 16, 64>}, {transform_indices = @transform_4, window_bounds = array<i64: 16, 64>}]} {
    %c0_i32 = arith.constant 0 : i32
    %0 = arith.cmpi eq, %arg2, %c0_i32 : i32
    %1 = arith.extui %0 : i1 to i32
    %c0_i32_0 = arith.constant 0 : i32
    %2 = arith.cmpi ne, %1, %c0_i32_0 : i32
    scf.if %2 {
      %cst_10 = arith.constant 0.000000e+00 : f32
      %12 = vector.broadcast %cst_10 : f32 to vector<16x64xf32>
      %c0_11 = arith.constant 0 : index
      %c0_12 = arith.constant 0 : index
      %13 = vector.load %arg8[%c0_11, %c0_12] : memref<16x64xf32, #tpu.memory_space<vmem>>, vector<16x64xf32>
      tpu.vector_store %arg8[%c0_11, %c0_12], %12 {strides = array<i32>} : memref<16x64xf32, #tpu.memory_space<vmem>>, vector<16x64xf32>,
    } else {
    }
    %c0 = arith.constant 0 : index
    %c0_1 = arith.constant 0 : index
    %3 = vector.load %arg8[%c0, %c0_1] : memref<16x64xf32, #tpu.memory_space<vmem>>, vector<16x64xf32>
    %c0_2 = arith.constant 0 : index
    %c0_3 = arith.constant 0 : index
    %4 = vector.load %arg3[%c0_2, %c0_3] : memref<16x64xbf16, #tpu.memory_space<vmem>>, vector<16x64xbf16>
    %c0_4 = arith.constant 0 : index
    %c0_5 = arith.constant 0 : index
    %5 = vector.load %arg4[%c0_4, %c0_5] : memref<64x64xbf16, #tpu.memory_space<vmem>>, vector<64x64xbf16>
    %cst = arith.constant dense<0.000000e+00> : vector<16x64xf32>
    %6 = tpu.matmul %4, %5, %cst {dimension_numbers = #tpu.dot_dimension_numbers<[1], [0], [0], [1], [0, 0, 1, 1], [], []>} : vector<16x64xbf16>, vector<64x64xbf16>, vector<16x64xf32> -> vector<16x64xf32>
    %7 = arith.addf %3, %6 : vector<16x64xf32>
    %c0_6 = arith.constant 0 : index
    %c0_7 = arith.constant 0 : index
    %8 = vector.load %arg8[%c0_6, %c0_7] : memref<16x64xf32, #tpu.memory_space<vmem>>, vector<16x64xf32>
    tpu.vector_store %arg8[%c0_6, %c0_7], %7 {strides = array<i32>} : memref<16x64xf32, #tpu.memory_space<vmem>>, vector<16x64xf32>,
    %c0_i32_8 = arith.constant 0 : i32
    %9 = arith.cmpi eq, %arg2, %c0_i32_8 : i32
    %10 = arith.extui %9 : i1 to i32
    %c0_i32_9 = arith.constant 0 : i32
    %11 = arith.cmpi ne, %10, %c0_i32_9 : i32
    scf.if %11 {
      %c0_10 = arith.constant 0 : index
      %c0_11 = arith.constant 0 : index
      %12 = vector.load %arg5[%c0_10, %c0_11] : memref<16x16xbf16, #tpu.memory_space<vmem>>, vector<16x16xbf16>
      %c0_12 = arith.constant 0 : index
      %c0_13 = arith.constant 0 : index
      %13 = vector.load %arg6[%c0_12, %c0_13] : memref<16x64xbf16, #tpu.memory_space<vmem>>, vector<16x64xbf16>
      %cst_14 = arith.constant dense<0.000000e+00> : vector<16x64xf32>
      %14 = tpu.matmul %12, %13, %cst_14 {dimension_numbers = #tpu.dot_dimension_numbers<[1], [0], [0], [1], [0, 0, 1, 1], [], []>} : vector<16x16xbf16>, vector<16x64xbf16>, vector<16x64xf32> -> vector<16x64xf32>
      %c0_15 = arith.constant 0 : index
      %c0_16 = arith.constant 0 : index
      %15 = vector.load %arg8[%c0_15, %c0_16] : memref<16x64xf32, #tpu.memory_space<vmem>>, vector<16x64xf32>
      %16 = arith.addf %15, %14 : vector<16x64xf32>
      %17 = arith.truncf %16 : vector<16x64xf32> to vector<16x64xbf16>
      %c0_17 = arith.constant 0 : index
      %c0_18 = arith.constant 0 : index
      %18 = vector.load %arg7[%c0_17, %c0_18] : memref<16x64xbf16, #tpu.memory_space<vmem>>, vector<16x64xbf16>
      tpu.vector_store %arg7[%c0_17, %c0_18], %17 {strides = array<i32>} : memref<16x64xbf16, #tpu.memory_space<vmem>>, vector<16x64xbf16>,
    } else {
    }
    return
  }
  func.func @transform_0(%arg0: i32, %arg1: i32, %arg2: i32) -> (i32, i32) {
    %c0_i32 = arith.constant 0 : i32
    return %arg0, %arg2 : i32, i32
  }
  func.func @transform_1(%arg0: i32, %arg1: i32, %arg2: i32) -> (i32, i32) {
    %c0_i32 = arith.constant 0 : i32
    return %arg2, %arg1 : i32, i32
  }
  func.func @transform_2(%arg0: i32, %arg1: i32, %arg2: i32) -> (i32, i32) {
    %c0_i32 = arith.constant 0 : i32
    %c0_i32_0 = arith.constant 0 : i32
    return %arg0, %c0_i32 : i32, i32
  }
  func.func @transform_3(%arg0: i32, %arg1: i32, %arg2: i32) -> (i32, i32) {
    %c0_i32 = arith.constant 0 : i32
    %c0_i32_0 = arith.constant 0 : i32
    return %c0_i32, %arg1 : i32, i32
  }
  func.func @transform_4(%arg0: i32, %arg1: i32, %arg2: i32) -> (i32, i32) {
    %c0_i32 = arith.constant 0 : i32
    return %arg0, %arg1 : i32, i32
  }
}

</mosaic_0001>

<bundles_post_ra>
// kernel: attention_forward.3
= control target key start
LH: loop header
LB: loop body
LE: loop exit
PB: predicated region body
PF: predicated region fallthrough
CT: control target
= control target key end

     0   :  { %9 = vsyncpa [#allocation4], 0  ;;  %s452_s0 = inlined_call_operand.vmem [shape: bf16[16,64], index: 0, kind: input, shape index: {}]   ;;  %s453_s1 = inlined_call_operand.hbm [shape: bf16[64,192], index: 1, kind: input, shape index: {}]   ;;  %s454_s2 = inlined_call_operand.vmem [shape: bf16[16,48], index: 2, kind: input, shape index: {}]   ;;  %s455_s3 = inlined_call_operand.hbm [shape: bf16[48,192], index: 3, kind: input, shape index: {}]   ;;  %s456_s4 = inlined_call_operand.vmem [shape: bf16[16,192], index: 4, kind: output, shape index: {}]  }
   0x1   :  { %s17_s17 = sshll.u32 %s453_s1, 4  ;;  %s18_s17 = int_to_ptr.hbm [resolvable:$true] %s17_s17 }
   0x2   :  { %10 = vsyncpa [#allocation6], 0  ;;  %s398_s18 = smov [#allocation3]   ;;  %s32_s22 = sshll.u32 %s455_s3, 4  ;;  %s33_s22 = int_to_ptr.hbm [resolvable:$true] %s32_s22 }
   0x3   :  { %s19_s19 = sshll.u32 %s398_s18, 4  ;;  %s399_s23 = smov 128   ;;  %s20_s19 = int_to_ptr.vmem [resolvable:$true] %s19_s19 }
   0x4   :  { %s400_s24 = smov 8   ;;  %s401_s25 = smov [#allocation5]  }
   0x5   :  { %25 = dma.hbm_to_vmem [thread:$0]  %s18_s17, 1024, %s20_s19, [#allocation4], %s399_s23, %s399_s23, %s400_s24  }
   0x6   :  { %s34_s26 = sshll.u32 %s401_s25, 4  ;;  %s35_s26 = int_to_ptr.vmem [resolvable:$true] %s34_s26 }
   0x7   :  { %40 = dma.hbm_to_vmem [thread:$0]  %s33_s22, 768, %s35_s26, [#allocation6], %s399_s23, %s399_s23, %s400_s24  }
   0x8   :  { %394 = dma.done.wait [#allocation4], 1024  }
   0x9   :  { %395 = vsyncadd [#allocation4], 4294966272 }
   0xa   :  { %396 = dma.done.wait [#allocation6], 768  }
   0xb   :  { %397 = vsyncadd [#allocation6], 4294966528  ;;  %vm55_vm0 = vcmask 523264   ;;  %v402_v0 = vmov 0.0   ;;  %v287_v1 = vld [vmem:[#allocation3 + $0x30] sm:$0xf] }
   0xc   :  { %56 = vst.msk [vmem:[#allocation2 + $0x8] sm:$0xff] %vm55_vm0, %v402_v0  ;;  %v333_v2 = vld [vmem:[#allocation3 + $0x34] sm:$0xf0]  ;;  %v332_v3 = vld [vmem:[#allocation3 + $0x34] sm:$0xf]  ;;  %v334_v41 = vld [vmem:[%s454_s2] sm:$0xff] }
   0xd   :  { %58 = vst.msk [vmem:[#allocation2 + $0x18] sm:$0xff] %vm55_vm0, %v402_v0  ;;  %v288_v4 = vor.u32 %v333_v2, %v287_v1  ;;  %v289_v5 = vld [vmem:[#allocation3 + $0x38] sm:$0xf0]  ;;  %v317_v6 = vld [vmem:[#allocation5 + $0x20] sm:$0xf]  ;;  %vm204_vm1 = vcmask 392192  }
   0xe   :  { %v340_v7 = vld [vmem:[#allocation5 + $0x24] sm:$0xf0]  ;;  %v292_v8 = vor.u32 %v332_v3, %v289_v5  ;;  %v339_v10 = vld [vmem:[#allocation5 + $0x24] sm:$0xf]  ;;  %v319_v11 = vld [vmem:[#allocation5 + $0x28] sm:$0xf0] }
   0xf   :  { %v318_v9 = vor.u32 %v340_v7, %v317_v6  ;;  %v279_v12 = vld [vmem:[#allocation3 + $0x20] sm:$0xf]  ;;  %126 = vmatpush.bf16.msra.mxu0 %v288_v4  ;;  %v322_v13 = vor.u32 %v339_v10, %v319_v11  ;;  %v331_v14 = vld [vmem:[#allocation3 + $0x24] sm:$0xf0]  ;;  %v330_v15 = vld [vmem:[#allocation3 + $0x24] sm:$0xf] }
  0x10   :  { %v281_v16 = vld [vmem:[#allocation3 + $0x28] sm:$0xf0]  ;;  %140 = vmatpush.bf16.msra.mxu1 %v292_v8  ;;  %v280_v17 = vor.u32 %v331_v14, %v279_v12  ;;  %v309_v19 = vld [vmem:[#allocation5 + $0x10] sm:$0xf]  ;;  %v338_v20 = vld [vmem:[#allocation5 + $0x14] sm:$0xf0] }
  0x11   :  { %213 = vmatpush.bf16.msra.mxu2 %v318_v9  ;;  %v284_v18 = vor.u32 %v330_v15, %v281_v16  ;;  %v337_v21 = vld [vmem:[#allocation5 + $0x14] sm:$0xf]  ;;  %227 = vmatpush.bf16.msra.mxu3 %v322_v13  ;;  %v310_v22 = vor.u32 %v338_v20, %v309_v19  ;;  %v311_v23 = vld [vmem:[#allocation5 + $0x18] sm:$0xf0]  ;;  %v271_v24 = vld [vmem:[#allocation3 + $0x10] sm:$0xf] }
  0x12   :  { %v329_v25 = vld [vmem:[#allocation3 + $0x14] sm:$0xf0]  ;;  %v314_v26 = vor.u32 %v337_v21, %v311_v23  ;;  %v328_v27 = vld [vmem:[#allocation3 + $0x14] sm:$0xf]  ;;  %v273_v28 = vld [vmem:[#allocation3 + $0x18] sm:$0xf0] }
  0x13   :  { %v301_v29 = vld [vmem:[#allocation5] sm:$0xf]  ;;  %127 = vmatpush.bf16.msra.mxu0 %v280_v17  ;;  %v272_v30 = vor.u32 %v329_v25, %v271_v24  ;;  %v336_v31 = vld [vmem:[#allocation5 + $0x4] sm:$0xf0]  ;;  %v335_v32 = vld [vmem:[#allocation5 + $0x4] sm:$0xf]  ;;  %v276_v34 = vor.u32 %v328_v27, %v273_v28 }
  0x14   :  { %v303_v33 = vld [vmem:[#allocation5 + $0x8] sm:$0xf0]  ;;  %141 = vmatpush.bf16.msra.mxu1 %v284_v18  ;;  %v302_v35 = vor.u32 %v336_v31, %v301_v29  ;;  %v263_v36 = vld [vmem:[#allocation3] sm:$0xf]  ;;  %v327_v37 = vld [vmem:[#allocation3 + $0x4] sm:$0xf0] }
  0x15   :  { %214 = vmatpush.bf16.msra.mxu2 %v310_v22  ;;  %228 = vmatpush.bf16.msra.mxu3 %v314_v26  ;;  %v306_v38 = vor.u32 %v335_v32, %v303_v33  ;;  %v326_v39 = vld [vmem:[#allocation3 + $0x4] sm:$0xf]  ;;  %v265_v40 = vld [vmem:[#allocation3 + $0x8] sm:$0xf0]  ;;  %v264_v42 = vor.u32 %v327_v37, %v263_v36  ;;  %v62_v50 = vld [vmem:[#allocation2 + $0x18] sm:$0xff]  ;;  %vm246_vm2 = vcmask 1043456  }
  0x16   :  { %v268_v43 = vor.u32 %v326_v39, %v265_v40  ;;  %v325_v44 = vld [vmem:[%s452_s0] sm:$0xff]  ;;  %v60_v45 = vld [vmem:[#allocation2 + $0x8] sm:$0xff]  ;;  %vm247_vm3 = vcmask 523268  }
  0x17   :  { %128 = vmatpush.bf16.msra.mxu0 %v272_v30  ;;  %vm248_vm4 = vmor %vm247_vm3, %vm246_vm2 }
  0x18   :  { %142 = vmatpush.bf16.msra.mxu1 %v276_v34 }
  0x19   :  { %215 = vmatpush.bf16.msra.mxu2 %v302_v35  ;;  %229 = vmatpush.bf16.msra.mxu3 %v306_v38 }
  0x1b   :  { %129 = vmatpush.bf16.msra.mxu0 %v264_v42 }
  0x1c   :  { %323 = vmatmul.msk.bf16.vlgmr.msra.gmra.mxu2 %vm204_vm1, %v334_v41  ;;  %324 = vmatmul.msk.bf16.vlgmr.msra.gmra.mxu3 %vm204_vm1, %v334_v41 }
  0x1d   :  { %143 = vmatpush.bf16.msra.mxu1 %v268_v43 }
  0x1e   :  { %293 = vmatmul.msk.bf16.vlgmr.msra.gmra.mxu0 %vm55_vm0, %v325_v44 }
  0x20   :  { %294 = vmatmul.msk.bf16.vlgmr.msra.gmra.mxu1 %vm55_vm0, %v325_v44 }
  0x9b   :  { %v131_v46 = vpop.f32.mrf.mxu0 }
  0x9d   :  { %v145_v47 = vpop.f32.mrf.mxu1 }
  0x9e   :  { %v151_v48 = vadd.f32 %v145_v47, %v60_v45 }
  0x9f   :  { %v217_v49 = vpop.f32.mrf.mxu2  ;;  %v231_v52 = vpop.f32.mrf.mxu3 }
  0xa0   :  { %155 = vst.msk [vmem:[#allocation2 + $0x8] sm:$0xff] %vm55_vm0, %v151_v48  ;;  %v240_v54 = vadd.f32 %v217_v49, %v131_v46 }
  0xa3   :  { %v133_v51 = vpop.f32.mrf.mxu0 }
  0xa5   :  { %v147_v53 = vpop.f32.mrf.mxu1 }
  0xa6   :  { %v153_v55 = vadd.f32 %v147_v53, %v62_v50 }
  0xa7   :  { %v237_v56 = vld [vmem:[#allocation2 + $0x8] sm:$0xff]  ;;  %v219_v59 = vpop.f32.mrf.mxu2  ;;  %v233_v60 = vpop.f32.mrf.mxu3 }
  0xa8   :  { %v241_v57 = vadd.f32 %v237_v56, %v231_v52  ;;  %157 = vst.msk [vmem:[#allocation2 + $0x18] sm:$0xff] %vm55_vm0, %v153_v55  ;;  %v242_v62 = vadd.f32 %v219_v59, %v133_v51 }
  0xaa   :  { %v244_v58 = vpack.c.bf16 %v241_v57, %v240_v54 }
  0xac   :  { %249 = vst.msk [vmem:[%s456_s4] sm:$0xff] %vm248_vm4, %v244_v58 }
  0xaf   :  { %v239_v61 = vld [vmem:[#allocation2 + $0x18] sm:$0xff] }
  0xb0   :  { %v243_v63 = vadd.f32 %v239_v61, %v233_v60 }
  0xb2   :  { %v245_v0 = vpack.c.bf16 %v243_v63, %v242_v62 }
  0xb4   :  { %250 = vst.msk [vmem:[%s456_s4 + $0x8] sm:$0xff] %vm248_vm4, %v245_v0 }
  0xb5   :  { %255 = vsyncpa [#allocation4], 1 }
  0xb6   :  { %256 = vsyncpa [#allocation6], 1 }

// kernel: attention_forward.5
= control target key start
LH: loop header
LB: loop body
LE: loop exit
PB: predicated region body
PF: predicated region fallthrough
CT: control target
= control target key end

     0   :  { %vm23_vm0 = vcmask 523264   ;;  %v219_v2 = vmov 0.0   ;;  %s277_s0 = inlined_call_operand.vmem [shape: bf16[16,64], index: 0, kind: input, shape index: {}]   ;;  %s278_s1 = inlined_call_operand.vmem [shape: bf16[64,64], index: 1, kind: input, shape index: {}]   ;;  %s279_s2 = inlined_call_operand.vmem [shape: bf16[16,16], index: 2, kind: input, shape index: {}]   ;;  %s280_s3 = inlined_call_operand.vmem [shape: bf16[16,64], index: 3, kind: input, shape index: {}]   ;;  %s281_s4 = inlined_call_operand.hbm [shape: bf16[16,64], index: 4, kind: output, shape index: {}]  }
   0x1   :  { %v186_v0 = vld [vmem:[%s278_s1 + $0x18] sm:$0xff]  ;;  %v188_v1 = vld [vmem:[%s280_s3] sm:$0xff]  ;;  %24 = vst.msk [vmem:[#allocation2] sm:$0xff] %vm23_vm0, %v219_v2  ;;  %v185_v3 = vld [vmem:[%s278_s1 + $0x10] sm:$0xff] }
   0x2   :  { %75 = vmatpush.bf16.msra.mxu0 %v186_v0  ;;  %v187_v4 = vld [vmem:[%s279_s2] sm:$0xff]  ;;  %25 = vst.msk [vmem:[#allocation2 + $0x8] sm:$0xff] %vm23_vm0, %v219_v2 }
   0x3   :  { %9 = vsyncpa [#allocation4], 0  ;;  %118 = vmatpush.bf16.msra.mxu1 %v188_v1  ;;  %vm107_vm1 = vcmask 130048   ;;  %v184_v5 = vld [vmem:[%s278_s1 + $0x8] sm:$0xff]  ;;  %v183_v6 = vld [vmem:[%s278_s1] sm:$0xff]  ;;  %vm131_vm2 = vcmask 519168  }
   0x4   :  { %v182_v7 = vld [vmem:[%s277_s0] sm:$0xff]  ;;  %s220_s0 = smov [#allocation3]   ;;  %s140_s29 = sshll.u32 %s281_s4, 4  ;;  %s141_s29 = int_to_ptr.hbm [resolvable:$true] %s140_s29 }
   0x5   :  { %s138_s1 = sshll.u32 %s220_s0, 4  ;;  %s221_s30 = smov 64   ;;  %s139_s1 = int_to_ptr.vmem [resolvable:$true] %s138_s1 }
   0x6   :  { %76 = vmatpush.bf16.msra.mxu0 %v185_v3  ;;  %181 = vmatmul.msk.bf16.vlgmr.msra.gmra.mxu1 %vm107_vm1, %v187_v4  ;;  %s222_s5 = smov 4  }
   0x8   :  { %v26_v8 = vld [vmem:[#allocation2] sm:$0xff] }
   0x9   :  { %v27_v11 = vld [vmem:[#allocation2 + $0x8] sm:$0xff] }
   0xa   :  { %77 = vmatpush.bf16.msra.mxu0 %v184_v5 }
   0xe   :  { %78 = vmatpush.bf16.msra.mxu0 %v183_v6 }
  0x11   :  { %172 = vmatmul.msk.bf16.vlgmr.msra.gmra.mxu0 %vm23_vm0, %v182_v7 }
  0x83   :  { %v120_v12 = vpop.f32.mrf.mxu1 }
  0x8b   :  { %v122_v18 = vpop.f32.mrf.mxu1 }
  0x8e   :  { %v80_v9 = vpop.f32.mrf.mxu0 }
  0x8f   :  { %v85_v10 = vadd.f32 %v80_v9, %v26_v8 }
  0x91   :  { %87 = vst.msk [vmem:[#allocation2] sm:$0xff] %vm23_vm0, %v85_v10 }
  0x96   :  { %v82_v13 = vpop.f32.mrf.mxu0 }
  0x97   :  { %v86_v14 = vadd.f32 %v82_v13, %v27_v11 }
  0x98   :  { %v125_v15 = vld [vmem:[#allocation2] sm:$0xff] }
  0x99   :  { %v127_v16 = vadd.f32 %v125_v15, %v120_v12  ;;  %88 = vst.msk [vmem:[#allocation2 + $0x8] sm:$0xff] %vm23_vm0, %v86_v14 }
  0x9b   :  { %v129_v17 = vpack.c.bf16 %v127_v16, %v127_v16 }
  0x9d   :  { %132 = vst.msk [vmem:[#allocation3] sm:$0xf] %vm131_vm2, %v129_v17 }
  0xa0   :  { %v126_v19 = vld [vmem:[#allocation2 + $0x8] sm:$0xff] }
  0xa1   :  { %v128_v20 = vadd.f32 %v126_v19, %v122_v18 }
  0xa3   :  { %v130_v21 = vpack.c.bf16 %v128_v20, %v128_v20 }
  0xa5   :  { %133 = vst.msk [vmem:[#allocation3 + $0x4] sm:$0xf] %vm131_vm2, %v130_v21 }
  0xa6   :  { %146 = dma.vmem_to_hbm [thread:$0]  %s139_s1, 128, %s141_s29, [#allocation4], %s221_s30, %s221_s30, %s222_s5  }
  0xa7   :  { %217 = dma.done.wait [#allocation4], 128  }
  0xa8   :  { %218 = vsyncadd [#allocation4], 4294967168 }
  0xa9   :  { %151 = vsyncpa [#allocation4], 1 }

// kernel: attention_forward.4
= control target key start
LH: loop header
LB: loop body
LE: loop exit
PB: predicated region body
PF: predicated region fallthrough
CT: control target
= control target key end

     0   :  { %s1041_s12 = smov 0   ;;  %s1043_s13 = smov 0   ;;  %s1179_s0 = inlined_call_operand.vmem [shape: bf16[2,4,8,16], index: 0, kind: input, shape index: {}]   ;;  %s1180_s1 = inlined_call_operand.vmem [shape: bf16[2,4,8,16], index: 1, kind: input, shape index: {}]   ;;  %s1181_s2 = inlined_call_operand.vmem [shape: bf16[2,4,8,16], index: 2, kind: input, shape index: {}]   ;;  %s1182_s3 = inlined_call_operand.vmem [shape: bf16[2,8,64], index: 3, kind: output, shape index: {}]  }
   0x1   :  { %s1045_s14 = smov 0  }
   0x2 LB: > { %s39_s15 = sadd.s32 1, %s1009_s13  ;;  %p913_p0 = scmp.ge.s32.totalorder %s1013_s14, 1  ;;  %s1013_s14 = sphi %s1045_s14, %s13_s14   ;;  %s1009_s13 = sphi %s1043_s13, %s1184_s13   ;;  %s1005_s12 = sphi %s1041_s12, %s1183_s12  }
   0x3   : > { %p41_p1 = scmp.ge.s32.totalorder %s39_s15, 2  ;;  %p239_p2 = scmp.lt.s32.totalorder %s1013_s14, 3 }
   0x5   : > { %s1186_s15 = smov (%p41_p1, %s39_s15), 0  ;;  %p240_p3 = pnand %p913_p0, %p239_p2 }
   0x6   : > { %p304_p4 = scmp.lt.s32.totalorder (!%p240_p3), %s1005_s12, 1  ;;  %s1018_s26 = smov (!%p240_p3), 32  }
   0x7   : > { %243 = sbr.rel (%p240_p3) target bundleno = 833 (0x341), region = 32  ;;  %s1019_s27 = smov (!%p240_p3), 16  }
   0x8   : > { %s1020_s28 = smov (!%p240_p3), 48  }
   0xc   : > { %s1188_s12 = smov (!%p304_p4, %s1005_s12), 1  ;;  %vm374_vm0 = vcmask 130048   ;;  %vm365_vm1 = vcmask 7168   ;;  %v1015_v11 = vmov -inf   ;;  %v472_v12 = vlaneseq }
   0xd   : > { %s1062_s16 = sshll.u32 %s1188_s12, 4  ;;  %367 = vst.msk [vmem:[#allocation2 + $0x8] sm:$0xff] %vm365_vm1, %v1015_v11  ;;  %vm496_vm3 = vcmask 64512   ;;  %v1016_v28 = vmov 0   ;;  %v1017_v29 = vmov 0.0   ;;  %vm625_vm4 = vcmask 1043456  }
   0xe   : > { %s329_s19 = scalar_lea.vmem %s1180_s1, %s1062_s16  ;;  %s314_s22 = scalar_lea.vmem %s1179_s0, %s1062_s16  ;;  %366 = vst.msk [vmem:[#allocation2] sm:$0xff] %vm365_vm1, %v1015_v11  ;;  %v473_v14 = vshrl.u32 %v472_v12, 7  ;;  %v475_v15 = vand.u32 127, %v472_v12  ;;  %966 = vset.pattern.permute.xlu0 %v1016_v28  ;;  %964 = vset.pattern.permute.xlu1 %v1016_v28  ;;  %vm764_vm5 = vcmask 261120   ;;  %vm766_vm6 = vcmask 392192  }
   0xf   : > { %v388_v0 = vld [vmem:[%s329_s19 + $0x4] sm:$0xf]  ;;  %v389_v1 = vld [vmem:[%s329_s19 + $0x8] sm:$0xf]  ;;  %v390_v2 = vld [vmem:[%s329_s19 + $0xc] sm:$0xf]  ;;  %965 = vset.pattern.permute.xlu2 %v1016_v28  ;;  %s1129_s25 = scalar_lea.vmem %s1181_s2, %s1062_s16 }
  0x10   : > { %v415_v3 = vsel %vm374_vm0, %v388_v0, 0  ;;  %v434_v4 = vsel %vm374_vm0, %v389_v1, 0  ;;  %v453_v5 = vsel %vm374_vm0, %v390_v2, 0  ;;  %v384_v6 = vld [vmem:[%s314_s22 + $0x4] sm:$0xf]  ;;  %368 = vst.msk [vmem:[#allocation2 + $0x10] sm:$0xff] %vm365_vm1, %v1015_v11  ;;  %vm476_vm2 = vcmp.le.s32.totalorder %v475_v15, %v473_v14 }
  0x11   : > { %424 = vmatpush.bf16.xpose.msra.mxu1 %v415_v3  ;;  %443 = vmatpush.bf16.xpose.msra.mxu2 %v434_v4  ;;  %v385_v7 = vld [vmem:[%s314_s22 + $0x8] sm:$0xf]  ;;  %v386_v8 = vld [vmem:[%s314_s22 + $0xc] sm:$0xf]  ;;  %v387_v9 = vld [vmem:[%s329_s19] sm:$0xf] }
  0x12   : > { %462 = vmatpush.bf16.xpose.msra.mxu3 %v453_v5  ;;  %v396_v10 = vsel %vm374_vm0, %v387_v9, 0  ;;  %369 = vst.msk [vmem:[#allocation2 + $0x18] sm:$0xff] %vm365_vm1, %v1015_v11  ;;  %v383_v13 = vld [vmem:[%s314_s22] sm:$0xf]  ;;  %v621_v46 = vld [vmem:[%s1129_s25 + $0xc] sm:$0xf] }
  0x13   : > { %405 = vmatpush.bf16.xpose.msra.mxu0 %v396_v10  ;;  %373 = vst.msk [vmem:[#allocation3 + $0x18] sm:$0xff] %vm365_vm1, %v1017_v29  ;;  %v684_v47 = vsel %vm625_vm4, %v621_v46, 0  ;;  %v619_v48 = vld [vmem:[%s1129_s25 + $0x4] sm:$0xf]  ;;  %v620_v50 = vld [vmem:[%s1129_s25 + $0x8] sm:$0xf] }
  0x14   : > { %370 = vst.msk [vmem:[#allocation3] sm:$0xff] %vm365_vm1, %v1017_v29  ;;  %v1104_v30 = vld [vmem:[#allocation2 + $0x8] sm:$0xff]  ;;  %v646_v49 = vsel %vm625_vm4, %v619_v48, 0  ;;  %v665_v51 = vsel %vm625_vm4, %v620_v50, 0  ;;  %v618_v28 = vld [vmem:[%s1129_s25] sm:$0xf] }
  0x15   : > { %371 = vst.msk [vmem:[#allocation3 + $0x8] sm:$0xff] %vm365_vm1, %v1017_v29  ;;  %v492_v5 = vld [vmem:[#allocation2] sm:$0xff]  ;;  %s920_s29 = sshll.u32 %s1188_s12, 2  ;;  %vm769_vm7 = vcmask 519168  }
  0x16   : > { %372 = vst.msk [vmem:[#allocation3 + $0x10] sm:$0xff] %vm365_vm1, %v1017_v29  ;;  %s359_s5 = scalar_lea.vmem %s1182_s3, %s920_s29 }
  0x17   : > { %375 = vst.msk [vmem:[#allocation4] sm:$0xff] %vm374_vm0, %v1017_v29  ;;  %v1114_v35 = vld [vmem:[#allocation2 + $0x10] sm:$0xff] }
  0x18   : > { %922 = vmatmul.msk.bf16.vlgmr.msra.gmra.mxu1 %vm374_vm0, %v384_v6  ;;  %923 = vmatmul.msk.bf16.vlgmr.msra.gmra.mxu2 %vm374_vm0, %v385_v7  ;;  %376 = vst.msk [vmem:[#allocation4 + $0x8] sm:$0xff] %vm374_vm0, %v1017_v29 }
  0x19   : > { %924 = vmatmul.msk.bf16.vlgmr.msra.gmra.mxu3 %vm374_vm0, %v386_v8  ;;  %377 = vst.msk [vmem:[#allocation4 + $0x10] sm:$0xff] %vm374_vm0, %v1017_v29  ;;  %v495_v40 = vld [vmem:[#allocation2 + $0x18] sm:$0xff]  ;;  %655 = vmatpush.bf16.msrb.mxu1 %v646_v49 }
  0x1a   : > { %921 = vmatmul.msk.bf16.vlgmr.msra.gmra.mxu0 %vm374_vm0, %v383_v13  ;;  %378 = vst.msk [vmem:[#allocation4 + $0x18] sm:$0xff] %vm374_vm0, %v1017_v29  ;;  %693 = vmatpush.bf16.msrb.mxu3 %v684_v47  ;;  %v560_v12 = vld [vmem:[#allocation3 + $0x18] sm:$0xff] }
  0x1b   : > { %674 = vmatpush.bf16.msrb.mxu2 %v665_v51 }
  0x1c   : > { %v558_v46 = vld [vmem:[#allocation3 + $0x8] sm:$0xff] }
  0x95   : > { %v426_v16 = vpop.f32.mrf.mxu1 }
  0x96   : > { %v1085_v17 = vsel %vm476_vm2, %v426_v16, -1e+30 }
  0x97   : > { %v500_v18 = vsel %vm496_vm3, %v1085_v17, -inf  ;;  %v407_v33 = vpop.f32.mrf.mxu0 }
  0x98   : > { %501 = vmax.xlane.f32.xlu1 %v500_v18  ;;  %v1121_v44 = vsel %vm476_vm2, %v407_v33, -1e+30 }
  0x99   : > { %v497_v45 = vsel %vm496_vm3, %v1121_v44, -inf }
  0x9b   : > { %v445_v19 = vpop.f32.mrf.mxu2 }
  0x9c   : > { %v1090_v20 = vsel %vm476_vm2, %v445_v19, -1e+30  ;;  %v464_v21 = vpop.f32.mrf.mxu3  ;;  %v559_v19 = vld [vmem:[#allocation3 + $0x10] sm:$0xff] }
  0x9d   : > { %v503_v22 = vsel %vm496_vm3, %v1090_v20, -inf  ;;  %v428_v23 = vpop.f32.mrf.mxu1  ;;  %v480_v24 = vsel %vm476_vm2, %v464_v21, -1e+30 }
  0x9e   : > { %504 = vmax.xlane.f32.xlu0 %v503_v22  ;;  %v506_v26 = vsel %vm496_vm3, %v480_v24, -inf }
  0x9f   : > { %v409_v39 = vpop.f32.mrf.mxu0 }
  0xa3   : > { %v447_v25 = vpop.f32.mrf.mxu2 }
  0xa4   : > { %v466_v27 = vpop.f32.mrf.mxu3 }
  0xa6   : > { %507 = vmax.xlane.f32.xlu0 %v506_v26 }
 0x10b   : > { %v502_v31 = vpop.xlane.xlu1 %501 }
 0x10c   : > { %v1107_v32 = vmax.f32 %v1104_v30, %v502_v31  ;;  %v627_v31 = vsel %vm625_vm4, %v618_v28, 0 }
 0x10d   : > { %636 = vmatpush.bf16.msrb.mxu0 %v627_v31 }
 0x10e   : > { %v514_v34 = vsub.f32 %v1104_v30, %v1107_v32  ;;  %708 = vst.msk [vmem:[#allocation2 + $0x8] sm:$0xff] %vm365_vm1, %v1107_v32  ;;  %532 = vperm.xlu0 %966, %v1107_v32  }
 0x111   : > { %v505_v36 = vpop.xlane.xlu0 %504 }
 0x112   : > { %v511_v37 = vmax.f32 %v1114_v35, %v505_v36 }
 0x114   : > { %v515_v38 = vsub.f32 %v1114_v35, %v511_v37  ;;  %709 = vst.msk [vmem:[#allocation2 + $0x10] sm:$0xff] %vm365_vm1, %v511_v37  ;;  %537 = vperm.xlu1 %964, %v511_v37  }
 0x116   : > { %v521_v13 = vmul.f32 1.442695, %v515_v38 }
 0x119   : > { %v508_v41 = vpop.xlane.xlu0 %507 }
 0x11a   : > { %v512_v42 = vmax.f32 %v495_v40, %v508_v41 }
 0x11c   : > { %v516_v43 = vsub.f32 %v495_v40, %v512_v42  ;;  %710 = vst.msk [vmem:[#allocation2 + $0x18] sm:$0xff] %vm365_vm1, %v512_v42  ;;  %542 = vperm.xlu2 %965, %v512_v42  }
 0x11e   : > { %v523_v10 = vmul.f32 1.442695, %v516_v43  ;;  %v519_v43 = vmul.f32 1.442695, %v514_v34 }
 0x145   : > { %498 = vmax.xlane.f32.xlu2 %v497_v45 }
 0x176   : > { %v543_v52 = vpop.permute.xlu2 %542 }
 0x177   : > { %v548_v53 = vsub.f32 %v480_v24, %v543_v52  ;;  %v588_v52 = vld [vmem:[#allocation4 + $0x10] sm:$0xff] }
 0x179   : > { %v555_v54 = vmul.f32 1.442695, %v548_v53 }
 0x17b   : > { %967 = vpow2.f32 %v555_v54 }
 0x180   : > { %v533_v55 = vpop.permute.xlu0 %532 }
 0x181   : > { %v968_v56 = vpop.eup %967  ;;  %v546_v57 = vsub.f32 %v1085_v17, %v533_v55 }
 0x182   : > { %v574_v58 = vsel %vm496_vm3, %v968_v56, 0.0  ;;  %v617_v59 = vpack.c.bf16 %v968_v56, %v968_v56 }
 0x183   : > { %v551_v60 = vmul.f32 1.442695, %v546_v57  ;;  %575 = vadd.xlane.f32.xlu0 %v574_v58  ;;  %v557_v57 = vld [vmem:[#allocation3] sm:$0xff] }
 0x184   : > { %928 = vmatmul.msk.bf16.vlgmr.msrb.gmra.mxu3 %vm496_vm3, %v617_v59 }
 0x185   : > { %969 = vpow2.f32 %v551_v60 }
 0x186   : > { %v538_v61 = vpop.permute.xlu1 %537 }
 0x187   : > { %v547_v62 = vsub.f32 %v1090_v20, %v538_v61  ;;  %v587_v61 = vld [vmem:[#allocation4 + $0x8] sm:$0xff] }
 0x189   : > { %v553_v63 = vmul.f32 1.442695, %v547_v62  ;;  %v586_v62 = vld [vmem:[#allocation4] sm:$0xff] }
 0x18b   : > { %v970_v0 = vpop.eup %969  ;;  %971 = vpow2.f32 %v553_v63 }
 0x18c   : > { %v615_v1 = vpack.c.bf16 %v970_v0, %v970_v0  ;;  %v568_v9 = vsel %vm496_vm3, %v970_v0, 0.0  ;;  %973 = vpow2.f32 %v523_v10 }
 0x18d   : > { %975 = vpow2.f32 %v521_v13 }
 0x18e   : > { %926 = vmatmul.msk.bf16.vlgmr.msrb.gmra.mxu1 %vm496_vm3, %v615_v1 }
 0x191   : > { %v972_v2 = vpop.eup %971 }
 0x192   : > { %v571_v3 = vsel %vm496_vm3, %v972_v2, 0.0  ;;  %v616_v4 = vpack.c.bf16 %v972_v2, %v972_v2  ;;  %v974_v11 = vpop.eup %973 }
 0x193   : > { %572 = vadd.xlane.f32.xlu2 %v571_v3  ;;  %v564_v14 = vmul.f32 %v974_v11, %v560_v12  ;;  %v976_v18 = vpop.eup %975 }
 0x194   : > { %927 = vmatmul.msk.bf16.vlgmr.msrb.gmra.mxu2 %vm496_vm3, %v616_v4  ;;  %v563_v21 = vmul.f32 %v976_v18, %v559_v19 }
 0x1b8   : > { %v499_v6 = vpop.xlane.xlu2 %498 }
 0x1b9   : > { %v509_v7 = vmax.f32 %v492_v5, %v499_v6 }
 0x1bb   : > { %v513_v8 = vsub.f32 %v492_v5, %v509_v7  ;;  %707 = vst.msk [vmem:[#allocation2] sm:$0xff] %vm365_vm1, %v509_v7  ;;  %527 = vperm.xlu1 %964, %v509_v7   ;;  %v589_v7 = vld [vmem:[#allocation4 + $0x18] sm:$0xff] }
 0x1bd   : > { %v517_v17 = vmul.f32 1.442695, %v513_v8 }
 0x1bf   : > { %977 = vpow2.f32 %v517_v17 }
 0x1c5   : > { %v978_v20 = vpop.eup %977 }
 0x1c6   : > { %v561_v58 = vmul.f32 %v978_v20, %v557_v57 }
 0x1e5   : > { %569 = vadd.xlane.f32.xlu1 %v568_v9 }
 0x1f6   : > { %v576_v15 = vpop.xlane.xlu0 %575 }
 0x1f7   : > { %v580_v16 = vadd.f32 %v576_v15, %v564_v14 }
 0x1f9   : > { %585 = vst.msk [vmem:[#allocation3 + $0x18] sm:$0xff] %vm365_vm1, %v580_v16 }
 0x1fe   : > { %602 = vperm.xlu1 %964, %v976_v18  }
 0x200   : > { %v721_v50 = vld [vmem:[#allocation3 + $0x18] sm:$0xff] }
 0x206   : > { %592 = vperm.xlu1 %964, %v978_v20   ;;  %v573_v22 = vpop.xlane.xlu2 %572 }
 0x207   : > { %v579_v23 = vadd.f32 %v573_v22, %v563_v21  ;;  %v1147_v24 = vpop.f32.mrf.mxu3 }
 0x209   : > { %584 = vst.msk [vmem:[#allocation3 + $0x10] sm:$0xff] %vm365_vm1, %v579_v23 }
 0x20b   : > { %v657_v25 = vpop.f32.mrf.mxu1 }
 0x20f   : > { %v697_v26 = vpop.f32.mrf.mxu3 }
 0x210   : > { %v720_v27 = vld [vmem:[#allocation3 + $0x10] sm:$0xff] }
 0x211   : > { %979 = vrcp.f32 %v720_v27 }
 0x213   : > { %v659_v29 = vpop.f32.mrf.mxu1 }
 0x217   : > { %v980_v33 = vpop.eup %979  ;;  %v676_v35 = vpop.f32.mrf.mxu2 }
 0x218   : > { %738 = vperm.xlu0 %966, %v980_v33  }
 0x21f   : > { %v678_v36 = vpop.f32.mrf.mxu2 }
 0x22d   : > { %v528_v37 = vpop.permute.xlu1 %527 }
 0x22e   : > { %v545_v38 = vsub.f32 %v1121_v44, %v528_v37 }
 0x230   : > { %v549_v39 = vmul.f32 1.442695, %v545_v38 }
 0x232   : > { %981 = vpow2.f32 %v549_v39 }
 0x233   : > { %983 = vpow2.f32 %v519_v43 }
 0x238   : > { %v982_v40 = vpop.eup %981 }
 0x239   : > { %v565_v41 = vsel %vm496_vm3, %v982_v40, 0.0  ;;  %v614_v42 = vpack.c.bf16 %v982_v40, %v982_v40  ;;  %v984_v45 = vpop.eup %983 }
 0x23a   : > { %566 = vadd.xlane.f32.xlu2 %v565_v41  ;;  %v562_v47 = vmul.f32 %v984_v45, %v558_v46 }
 0x23b   : > { %925 = vmatmul.msk.bf16.vlgmr.msrb.gmra.mxu0 %vm496_vm3, %v614_v42 }
 0x252   : > { %597 = vperm.xlu2 %965, %v984_v45  }
 0x258   : > { %v570_v48 = vpop.xlane.xlu1 %569 }
 0x259   : > { %v578_v44 = vadd.f32 %v570_v48, %v562_v47 }
 0x25a   : > { %607 = vperm.xlu2 %965, %v974_v11  }
 0x25b   : > { %583 = vst.msk [vmem:[#allocation3 + $0x8] sm:$0xff] %vm365_vm1, %v578_v44 }
 0x262   : > { %v719_v49 = vld [vmem:[#allocation3 + $0x8] sm:$0xff] }
 0x263   : > { %985 = vrcp.f32 %v719_v49 }
 0x264   : > { %987 = vrcp.f32 %v721_v50 }
 0x269   : > { %v986_v51 = vpop.eup %985 }
 0x26a   : > { %733 = vperm.xlu2 %965, %v986_v51   ;;  %v988_v30 = vpop.eup %987 }
 0x270   : > { %v603_v53 = vpop.permute.xlu1 %602 }
 0x271   : > { %v612_v32 = vmul.f32 %v603_v53, %v588_v52 }
 0x272   : > { %743 = vperm.xlu2 %965, %v988_v30  }
 0x273   : > { %v701_v34 = vadd.f32 %v676_v35, %v612_v32 }
 0x275   : > { %705 = vst.msk [vmem:[#allocation4 + $0x10] sm:$0xff] %vm374_vm0, %v701_v34 }
 0x278   : > { %v593_v63 = vpop.permute.xlu1 %592 }
 0x279   : > { %v610_v2 = vmul.f32 %v593_v63, %v586_v62 }
 0x27c   : > { %v716_v54 = vld [vmem:[#allocation4 + $0x10] sm:$0xff] }
 0x28a   : > { %v739_v55 = vpop.permute.xlu0 %738 }
 0x28b   : > { %v748_v56 = vmul.f32 %v739_v55, %v716_v54 }
 0x28d   : > { %755 = vrot.lane.b32.xlu0 %v748_v56, %s1018_s26 }
 0x2ad   : > { %v567_v59 = vpop.xlane.xlu2 %566 }
 0x2ae   : > { %v577_v60 = vadd.f32 %v567_v59, %v561_v58 }
 0x2b0   : > { %582 = vst.msk [vmem:[#allocation3] sm:$0xff] %vm365_vm1, %v577_v60 }
 0x2b5   : > { %v598_v0 = vpop.permute.xlu2 %597 }
 0x2b6   : > { %v611_v1 = vmul.f32 %v598_v0, %v587_v61 }
 0x2b7   : > { %v718_v3 = vld [vmem:[#allocation3] sm:$0xff] }
 0x2b8   : > { %v700_v4 = vadd.f32 %v657_v25, %v611_v1  ;;  %v638_v5 = vpop.f32.mrf.mxu0  ;;  %989 = vrcp.f32 %v718_v3 }
 0x2b9   : > { %v699_v6 = vadd.f32 %v638_v5, %v610_v2 }
 0x2ba   : > { %704 = vst.msk [vmem:[#allocation4 + $0x8] sm:$0xff] %vm374_vm0, %v700_v4 }
 0x2bb   : > { %703 = vst.msk [vmem:[#allocation4] sm:$0xff] %vm374_vm0, %v699_v6 }
 0x2bd   : > { %v608_v8 = vpop.permute.xlu2 %607 }
 0x2be   : > { %v990_v9 = vpop.eup %989  ;;  %v613_v10 = vmul.f32 %v608_v8, %v589_v7 }
 0x2bf   : > { %728 = vperm.xlu2 %965, %v990_v9  }
 0x2c0   : > { %v702_v11 = vadd.f32 %v1147_v24, %v613_v10  ;;  %v640_v12 = vpop.f32.mrf.mxu0 }
 0x2c1   : > { %v715_v13 = vld [vmem:[#allocation4 + $0x8] sm:$0xff] }
 0x2c2   : > { %706 = vst.msk [vmem:[#allocation4 + $0x18] sm:$0xff] %vm374_vm0, %v702_v11  ;;  %v714_v20 = vld [vmem:[#allocation4] sm:$0xff] }
 0x2c5   : > { %v734_v14 = vpop.permute.xlu2 %733 }
 0x2c6   : > { %v747_v15 = vmul.f32 %v734_v14, %v715_v13 }
 0x2c8   : > { %751 = vrot.lane.b32.xlu1 %v747_v15, %s1019_s27 }
 0x2c9   : > { %v717_v16 = vld [vmem:[#allocation4 + $0x18] sm:$0xff] }
 0x2cd   : > { %v744_v17 = vpop.permute.xlu2 %743 }
 0x2ce   : > { %v749_v18 = vmul.f32 %v744_v17, %v717_v16 }
 0x2d0   : > { %759 = vrot.lane.b32.xlu2 %v749_v18, %s1020_s28 }
 0x2ff   : > { %v756_v23 = vpop.permute.xlu0 %755 }
 0x319   : > { %v729_v19 = vpop.permute.xlu2 %728 }
 0x31a   : > { %v746_v21 = vmul.f32 %v729_v19, %v714_v20 }
 0x32a   : > { %v760_v25 = vpop.permute.xlu2 %759 }
 0x33a   : > { %v752_v22 = vpop.permute.xlu1 %751 }
 0x33b   : > { %v763_v24 = vsel %vm374_vm0, %v746_v21, %v752_v22 }
 0x33c   : > { %v765_v26 = vsel %vm764_vm5, %v763_v24, %v756_v23 }
 0x33d   : > { %v767_v27 = vsel %vm766_vm6, %v765_v26, %v760_v25 }
 0x33e   : > { %v768_v28 = vpack.c.bf16 %v767_v27, %v767_v27 }
 0x340   : > { %770 = vst.msk [vmem:[%s359_s5] sm:$0xf] %vm769_vm7, %v768_v28 }
 0x341 PF: > { %s13_s14 = sadd.s32 1, %s1013_s14   ;;  %s1183_s12 = smov %s1009_s13 }
 0x342   : > { %p10_p5 = scmp.ge.s32.totalorder %s13_s14, 4   ;;  %s1184_s13 = smov %s1186_s15 }
 0x344   :  { %12 = sbr.rel (!%p10_p5) target bundleno = 2 (0x2), region = 88 }

</bundles_post_ra>
